<compile_context>
chip_gen: v5e
topology: v5e:2x2
jax: 0.10.0
libtpu: 0.0.40
codegen_flags: <defaults>
</compile_context>

<pallas_src>
import jax
import jax.numpy as jnp
from jax.experimental import pallas as pl
from jax.experimental.pallas import tpu as pltpu

BN_EPS = 1e-5
_VMEM_LIMIT = 32 * 1024 * 1024    # scoped-VMEM budget that is safe on v5e / v6e / v7x
_TILE_BUDGET = 8 * 1024 * 1024    # target bytes of live block buffers per grid step


def _stats_kernel(x_ref, w_ref, s_ref, sq_ref):
    # x_ref: (Cin, TS) input tile (spatial on lanes); w_ref: (Cout, Cin) resident weight.
    # Emits this tile's partial per-channel sum / sum-of-squares of y = W @ X.
    y = jnp.dot(w_ref[...], x_ref[...], preferred_element_type=jnp.float32)
    s_ref[...] = jnp.sum(y, axis=1, keepdims=True)
    sq_ref[...] = jnp.sum(y * y, axis=1, keepdims=True)


def _normalize_kernel(x_ref, w_ref, scale_ref, shift_ref, o_ref):
    # Recompute y = W @ X and apply the folded BatchNorm affine: o = y * scale + shift.
    y = jnp.dot(w_ref[...], x_ref[...], preferred_element_type=jnp.float32)
    o_ref[...] = (y * scale_ref[...] + shift_ref[...]).astype(o_ref.dtype)


def _pick_spatial_tile(S, Cin, Cout, x_bytes, o_bytes):
    """Largest lane-dense spatial tile dividing S that fits the per-step VMEM budget."""
    # double-buffered input + output blocks plus the f32 matmul intermediate, per lane column
    per_col = 2 * Cin * x_bytes + 2 * Cout * o_bytes + Cout * 4
    max_ts = max(128, _TILE_BUDGET // max(per_col, 1))
    # Prefer multiples of 256 (v6e/v7x MXU) with a 128 fallback (v5e / small shapes).
    for ts in (4096, 2048, 1024, 512, 256, 128):
        if ts <= max_ts and S % ts == 0:
            return ts
    # Ragged spatial extents: largest divisor of S that fits the budget.
    for ts in range(min(S, max_ts), 0, -1):
        if S % ts == 0:
            return ts
    return S


def downsample_forward(x_nchw, conv_w, conv_b, bn_gamma, bn_beta):
    """x_nchw: (N, Cin, H, W); conv_w: (Cout, Cin, 1, 1); conv_b/bn_gamma/bn_beta: (Cout,)."""
    del conv_b  # exactly cancelled by train-mode BN mean subtraction (dead work on the hot path)
    N, Cin, H, W = x_nchw.shape
    Cout = conv_w.shape[0]
    Ho, Wo = (H + 1) // 2, (W + 1) // 2   # = floor((H-1)/2)+1 for kernel=1, stride=2
    S = Ho * Wo
    M = N * S

    # TODO(synk): fold this stride-2 gather into the kernels' BlockSpec DMA (strided
    # sublane/lane picks) to drop the extra HBM round-trip; with NCHW kept it is a single
    # XLA strided-slice copy and no transpose is ever materialized.
    x_s = x_nchw[:, :, ::2, ::2].reshape(N, Cin, S)
    w = conv_w.reshape(Cout, Cin)

    TS = _pick_spatial_tile(S, Cin, Cout, x_s.dtype.itemsize, x_nchw.dtype.itemsize)
    n_s = S // TS
    grid = (N, n_s)

    x_spec = pl.BlockSpec((None, Cin, TS), lambda n, s: (n, 0, s))
    w_spec = pl.BlockSpec((Cout, Cin), lambda n, s: (0, 0))          # stays VMEM-resident
    stat_spec = pl.BlockSpec((None, None, Cout, 1), lambda n, s: (n, s, 0, 0))
    compiler_params = pltpu.CompilerParams(
        dimension_semantics=("parallel", "parallel"),
        vmem_limit_bytes=_VMEM_LIMIT,
    )

    # Pass 1: partial per-channel statistics (per grid point -> fully parallel across cores).
    ysum, ysq = pl.pallas_call(
        _stats_kernel,
        grid=grid,
        in_specs=[x_spec, w_spec],
        out_specs=[stat_spec, stat_spec],
        out_shape=[jax.ShapeDtypeStruct((N, n_s, Cout, 1), jnp.float32),
                   jax.ShapeDtypeStruct((N, n_s, Cout, 1), jnp.float32)],
        compiler_params=compiler_params,
    )(x_s, w)

    # O(Cout) finalize: fold BatchNorm (train-mode batch stats, biased variance) into a single
    # per-channel scale/shift.  (E[y^2]-E[y]^2 accumulated in f32.)
    total = jnp.sum(ysum, axis=(0, 1))                    # (Cout, 1)
    total_sq = jnp.sum(ysq, axis=(0, 1))                  # (Cout, 1)
    mean = total / M
    var = jnp.maximum(total_sq / M - mean * mean, 0.0)
    inv_std = jax.lax.rsqrt(var + BN_EPS)
    scale = bn_gamma.astype(jnp.float32).reshape(Cout, 1) * inv_std
    shift = bn_beta.astype(jnp.float32).reshape(Cout, 1) - mean * scale

    # Pass 2: recompute the 1x1 conv and apply the folded affine; output in activation dtype.
    vec_spec = pl.BlockSpec((Cout, 1), lambda n, s: (0, 0))
    o_spec = pl.BlockSpec((None, Cout, TS), lambda n, s: (n, 0, s))
    y = pl.pallas_call(
        _normalize_kernel,
        grid=grid,
        in_specs=[x_spec, w_spec, vec_spec, vec_spec],
        out_specs=o_spec,
        out_shape=jax.ShapeDtypeStruct((N, Cout, S), x_nchw.dtype),
        compiler_params=compiler_params,
    )(x_s, w, scale, shift)

    return y.reshape(N, Cout, Ho, Wo)


def _reference(x_nchw, conv_w, conv_b, bn_gamma, bn_beta):
    # Pure-JAX reference matching the PyTorch module (conv bias included; it cancels under BN).
    N, Cin, H, W = x_nchw.shape
    Cout = conv_w.shape[0]
    x_s = x_nchw[:, :, ::2, ::2]
    y = jnp.einsum("nchw,oc->nohw", x_s, conv_w.reshape(Cout, Cin)) + conv_b[None, :, None, None]
    mean = jnp.mean(y, axis=(0, 2, 3), keepdims=True)
    var = jnp.mean((y - mean) ** 2, axis=(0, 2, 3), keepdims=True)
    return (y - mean) / jnp.sqrt(var + BN_EPS) * bn_gamma[None, :, None, None] + bn_beta[None, :, None, None]


if __name__ == "__main__":
    key = jax.random.PRNGKey(0)
    k_x, k_w, k_b = jax.random.split(key, 3)

    N, Cin, H, W = 2, 4, 16, 16
    Cout = 8

    x = jax.random.normal(k_x, (N, Cin, H, W), dtype=jnp.float32)

    # Parameter shapes match nn.Conv2d(Cin, Cout, 1, stride=2) + nn.BatchNorm2d(Cout) defaults.
    fan_in = Cin * 1 * 1
    bound = 1.0 / (fan_in ** 0.5)
    conv_w = jax.random.uniform(k_w, (Cout, Cin, 1, 1), jnp.float32, -bound, bound)
    conv_b = jax.random.uniform(k_b, (Cout,), jnp.float32, -bound, bound)
    bn_gamma = jnp.ones((Cout,), jnp.float32)
    bn_beta = jnp.zeros((Cout,), jnp.float32)

    out = downsample_forward(x, conv_w, conv_b, bn_gamma, bn_beta)
    out = jax.block_until_ready(out)

    ref = _reference(x, conv_w, conv_b, bn_gamma, bn_beta)
    assert out.shape == (N, Cout, (H + 1) // 2, (W + 1) // 2)
    assert jnp.allclose(out, ref, atol=1e-4, rtol=1e-4), float(jnp.max(jnp.abs(out - ref)))

    print("KERNEL_OK")
</pallas_src>

<mosaic_0001>
module attributes {stable_mosaic.version = 11 : i64} {
  func.func @_stats_kernel(%arg0: i32, %arg1: i32, %arg2: memref<1x4x64xf32, #tpu.memory_space<vmem>>, %arg3: memref<8x4xf32, #tpu.memory_space<vmem>>, %arg4: memref<1x1x8x1xf32, #tpu.memory_space<vmem>>, %arg5: memref<1x1x8x1xf32, #tpu.memory_space<vmem>>) attributes {dimension_semantics = [#tpu.dimension_semantics<parallel>, #tpu.dimension_semantics<parallel>], iteration_bounds = array<i64: 2, 1>, scalar_prefetch = 0 : i64, scratch_operands = 0 : i64, tpu.core_type = #tpu.core_type<tc>, window_params = [{transform_indices = @transform_0, window_bounds = array<i64: 1, 4, 64>}, {pipeline_mode = #tpu.pipeline_mode<synchronous>, transform_indices = @transform_1, window_bounds = array<i64: 8, 4>}, {transform_indices = @transform_2, window_bounds = array<i64: 1, 1, 8, 1>}, {transform_indices = @transform_3, window_bounds = array<i64: 1, 1, 8, 1>}]} {
    %c0 = arith.constant 0 : index
    %c0_0 = arith.constant 0 : index
    %0 = vector.load %arg3[%c0, %c0_0] : memref<8x4xf32, #tpu.memory_space<vmem>>, vector<8x4xf32>
    %c0_1 = arith.constant 0 : index
    %c0_2 = arith.constant 0 : index
    %c0_3 = arith.constant 0 : index
    %1 = vector.load %arg2[%c0_1, %c0_2, %c0_3] : memref<1x4x64xf32, #tpu.memory_space<vmem>>, vector<1x4x64xf32>
    %2 = vector.shape_cast %1 : vector<1x4x64xf32> to vector<4x64xf32>
    %cst = arith.constant dense<0.000000e+00> : vector<8x64xf32>
    %3 = tpu.matmul %0, %2, %cst {dimension_numbers = #tpu.dot_dimension_numbers<[1], [0], [0], [1], [0, 0, 1, 1], [], []>} : vector<8x4xf32>, vector<4x64xf32>, vector<8x64xf32> -> vector<8x64xf32>
    %cst_4 = arith.constant dense<0.000000e+00> : vector<8xf32>
    %4 = vector.multi_reduction <add>, %3, %cst_4 [1] : vector<8x64xf32> to vector<8xf32>
    %5 = vector.shape_cast %4 : vector<8xf32> to vector<8x1xf32>
    %c0_5 = arith.constant 0 : index
    %c0_6 = arith.constant 0 : index
    %c0_7 = arith.constant 0 : index
    %c0_8 = arith.constant 0 : index
    %6 = vector.load %arg4[%c0_5, %c0_6, %c0_7, %c0_8] : memref<1x1x8x1xf32, #tpu.memory_space<vmem>>, vector<1x1x8x1xf32>
    %7 = vector.shape_cast %6 : vector<1x1x8x1xf32> to vector<8x1xf32>
    %8 = vector.shape_cast %5 : vector<8x1xf32> to vector<1x1x8x1xf32>
    tpu.vector_store %arg4[%c0_5, %c0_6, %c0_7, %c0_8], %8 {strides = array<i32>} : memref<1x1x8x1xf32, #tpu.memory_space<vmem>>, vector<1x1x8x1xf32>,
    %9 = arith.mulf %3, %3 : vector<8x64xf32>
    %cst_9 = arith.constant dense<0.000000e+00> : vector<8xf32>
    %10 = vector.multi_reduction <add>, %9, %cst_9 [1] : vector<8x64xf32> to vector<8xf32>
    %11 = vector.shape_cast %10 : vector<8xf32> to vector<8x1xf32>
    %c0_10 = arith.constant 0 : index
    %c0_11 = arith.constant 0 : index
    %c0_12 = arith.constant 0 : index
    %c0_13 = arith.constant 0 : index
    %12 = vector.load %arg5[%c0_10, %c0_11, %c0_12, %c0_13] : memref<1x1x8x1xf32, #tpu.memory_space<vmem>>, vector<1x1x8x1xf32>
    %13 = vector.shape_cast %12 : vector<1x1x8x1xf32> to vector<8x1xf32>
    %14 = vector.shape_cast %11 : vector<8x1xf32> to vector<1x1x8x1xf32>
    tpu.vector_store %arg5[%c0_10, %c0_11, %c0_12, %c0_13], %14 {strides = array<i32>} : memref<1x1x8x1xf32, #tpu.memory_space<vmem>>, vector<1x1x8x1xf32>,
    return
  }
  func.func @transform_0(%arg0: i32, %arg1: i32) -> (i32, i32, i32) {
    %c0_i32 = arith.constant 0 : i32
    %c0_i32_0 = arith.constant 0 : i32
    return %arg0, %c0_i32, %arg1 : i32, i32, i32
  }
  func.func @transform_1(%arg0: i32, %arg1: i32) -> (i32, i32) {
    %c0_i32 = arith.constant 0 : i32
    %c0_i32_0 = arith.constant 0 : i32
    %c0_i32_1 = arith.constant 0 : i32
    return %c0_i32, %c0_i32_0 : i32, i32
  }
  func.func @transform_2(%arg0: i32, %arg1: i32) -> (i32, i32, i32, i32) {
    %c0_i32 = arith.constant 0 : i32
    %c0_i32_0 = arith.constant 0 : i32
    %c0_i32_1 = arith.constant 0 : i32
    return %arg0, %arg1, %c0_i32, %c0_i32_0 : i32, i32, i32, i32
  }
  func.func @transform_3(%arg0: i32, %arg1: i32) -> (i32, i32, i32, i32) {
    %c0_i32 = arith.constant 0 : i32
    %c0_i32_0 = arith.constant 0 : i32
    %c0_i32_1 = arith.constant 0 : i32
    return %arg0, %arg1, %c0_i32, %c0_i32_0 : i32, i32, i32, i32
  }
}

</mosaic_0001>

<bundles_post_ra>
// kernel: tpu_custom_call.1
= control target key start
LH: loop header
LB: loop body
LE: loop exit
PB: predicated region body
PF: predicated region fallthrough
CT: control target
= control target key end

     0   :  { %s452_s12 = smov 0   ;;  %s454_s13 = smov 0   ;;  %s491_s0 = inlined_call_operand.vmem [shape: f32[2,4,64], index: 0, kind: input, shape index: {}]   ;;  %s492_s1 = inlined_call_operand.vmem [shape: f32[8,4], index: 1, kind: input, shape index: {}]   ;;  %s493_s2 = inlined_call_operand.vmem [shape: f32[2,1,8,1], index: 2, kind: output, shape index: {0}]   ;;  %s494_s3 = inlined_call_operand.vmem [shape: f32[2,1,8,1], index: 3, kind: output, shape index: {1}]  }
   0x1   :  { %s456_s14 = smov 0  }
   0x2 LB: > { %s26_s15 = sadd.s32 1, %s426_s13  ;;  %p376_p0 = scmp.ge.s32.totalorder %s430_s14, 1  ;;  %s430_s14 = sphi %s456_s14, %s14_s14   ;;  %s426_s13 = sphi %s454_s13, %s496_s13   ;;  %s422_s12 = sphi %s452_s12, %s495_s12  }
   0x3   : > { %p28_p1 = scmp.ge.s32.totalorder %s26_s15, 2  ;;  %p160_p2 = scmp.lt.s32.totalorder %s430_s14, 3 }
   0x5   : > { %s498_s15 = smov (%p28_p1, %s26_s15), 0  ;;  %p161_p3 = pnand %p376_p0, %p160_p2 }
   0x6   : > { %p195_p4 = scmp.lt.s32.totalorder (!%p161_p3), %s422_s12, 1 }
   0x7   : > { %164 = sbr.rel (%p161_p3) target bundleno = 269 (0x10d), region = 28 }
   0xc   : > { %s500_s12 = smov (!%p195_p4, %s422_s12), 1  ;;  %vm222_vm0 = vcmask 1043456   ;;  %v216_v0 = vld [vmem:[%s492_s1] sm:$0xff]  ;;  %vm218_vm1 = vcmask 31744   ;;  %vm246_vm2 = vcmask 523264   ;;  %vm250_vm3 = vcmask 7168  }
   0xd   : > { %s377_s16 = sshll.u32 %s500_s12, 2  ;;  %s378_s22 = sshll.u32 %s500_s12, 3 }
   0xe   : > { %s201_s19 = scalar_lea.vmem %s491_s0, %s377_s16  ;;  %s208_s25 = scalar_lea.vmem %s493_s2, %s378_s22 }
   0xf   : > { %v217_v1 = vld [vmem:[%s201_s19] sm:$0xf]  ;;  %s215_s28 = scalar_lea.vmem %s494_s3, %s378_s22 }
  0x10   : > { %380 = vmatpush.msk.msra.mxu0 %vm222_vm0, %v217_v1 }
  0x11   : > { %381 = vmatmul.msk.f32.vlgmr.msra.gmra.mxu0 %vm218_vm1, %v216_v0 }
  0x8e   : > { %v243_v2 = vpop.f32.mrf.mxu0 }
  0x8f   : > { %v247_v3 = vsel %vm246_vm2, %v243_v2, 0.0  ;;  %v252_v4 = vmul.f32 %v243_v2, %v243_v2 }
  0x90   : > { %248 = vadd.xlane.f32.xlu0 %v247_v3 }
  0x91   : > { %v253_v5 = vsel %vm246_vm2, %v252_v4, 0.0 }
  0x98   : > { %254 = vadd.xlane.f32.xlu0 %v253_v5 }
 0x103   : > { %v249_v6 = vpop.xlane.xlu0 %248 }
 0x104   : > { %251 = vst.msk [vmem:[%s208_s25] sm:$0xff] %vm250_vm3, %v249_v6 }
 0x10b   : > { %v255_v7 = vpop.xlane.xlu0 %254 }
 0x10c   : > { %256 = vst.msk [vmem:[%s215_s28] sm:$0xff] %vm250_vm3, %v255_v7 }
 0x10d PF: > { %s14_s14 = sadd.s32 1, %s430_s14   ;;  %s495_s12 = smov %s426_s13 }
 0x10e   : > { %p11_p5 = scmp.ge.s32.totalorder %s14_s14, 4   ;;  %s496_s13 = smov %s498_s15 }
 0x110   :  { %13 = sbr.rel (!%p11_p5) target bundleno = 2 (0x2), region = 70 }

</bundles_post_ra>
